<compile_context>
chip_gen: v5e
topology: v5e:2x2
jax: 0.10.0
libtpu: 0.0.40
codegen_flags: <defaults>
</compile_context>

<pallas_src>
import functools

import jax
import jax.numpy as jnp
from jax.experimental import pallas as pl
from jax.experimental.pallas import tpu as pltpu


_TARGET_BLOCK_BYTES = 4 * 1024 * 1024   # per-stream block target (counted in f32 bytes)
_MIN_GRID_BLOCKS = 8                    # keep >=2 (ideally >=8) blocks for v7x dual TC

_HAS_INKERNEL_RNG = all(
    hasattr(pltpu, name) for name in ("prng_seed", "prng_random_bits", "stateful_normal")
)


def _saturated_sigmoid(y):
    # F.relu(1 - F.relu(1.1 - 1.2 * sigmoid(y))); sigmoid via tanh => one EUP push
    sig = 0.5 * (jnp.tanh(0.5 * y) + 1.0)
    return jnp.maximum(0.0, 1.0 - jnp.maximum(0.0, 1.1 - 1.2 * sig))


# ----------------------------- kernels -----------------------------

def _semhash_train_kernel(seed_ref, x_ref, o_ref):
    # In-kernel RNG: noise + selection bit generated on-chip, so kernel HBM traffic
    # is only x-in + out.  Seeded deterministically per block.
    pltpu.prng_seed(seed_ref[0] + pl.program_id(0))
    y = x_ref[...].astype(jnp.float32) + pltpu.stateful_normal(x_ref.shape, jnp.float32)
    v1 = _saturated_sigmoid(y)
    # straight-through branch: forward value of ((y > 0).float() + v1 - v1.detach())
    # TODO(synk): gradients require a custom_vjp routing the v2 branch through v1;
    # only the forward value is reproduced here.
    v2 = (y > 0.0).astype(jnp.float32)
    coin = (pltpu.prng_random_bits(x_ref.shape) & 1) == 0    # P = 0.5, one raw bit
    o_ref[...] = jnp.where(coin, v1, v2).astype(o_ref.dtype)


def _semhash_train_kernel_extrng(x_ref, noise_ref, u_ref, o_ref):
    # Fallback (old jax without stateful in-kernel PRNG): RNG streamed from HBM.
    y = x_ref[...].astype(jnp.float32) + noise_ref[...]
    v1 = _saturated_sigmoid(y)
    v2 = (y > 0.0).astype(jnp.float32)
    o_ref[...] = jnp.where(u_ref[...] < 0.5, v1, v2).astype(o_ref.dtype)


def _semhash_eval_kernel(x_ref, o_ref):
    o_ref[...] = (x_ref[...] > 0).astype(o_ref.dtype)


# --------------------------- tiling / params ---------------------------

def _slab_geometry(total):
    """Lane-dense 2D slab covering the leading rows*lane elements (no padding);
    returns (lane, rows, block_rows).  rows is a multiple of 8; the < 8*lane
    remainder is handled by plain JAX outside the kernel."""
    lane = 128
    for cand in (512, 256):
        if total // cand >= 8 * _MIN_GRID_BLOCKS:
            lane = cand
            break
    rows = (total // lane // 8) * 8
    if rows == 0:
        return lane, 0, 0
    block_rows = max(8, (_TARGET_BLOCK_BYTES // (lane * 4)) // 8 * 8)
    block_rows = min(block_rows, rows)
    # keep several blocks so dimension_semantics=("parallel",) can feed both v7x TCs
    while pl.cdiv(rows, block_rows) < _MIN_GRID_BLOCKS and block_rows > 8:
        block_rows = max(8, (block_rows // 2) // 8 * 8)
    return lane, rows, block_rows


@functools.lru_cache(maxsize=None)
def _vmem_limit_bytes():
    # Generation-aware: ~half of physical VMEM (64 MiB on v5e/v6e, 32 MiB on v7x).
    limit = 32 * 1024 * 1024
    try:
        if hasattr(pltpu, "get_tpu_info"):
            cap = int(pltpu.get_tpu_info().vmem_capacity_bytes)
            limit = max(limit, min(cap // 2, 64 * 1024 * 1024))
    except Exception:
        pass
    return limit


def _compiler_params():
    if not hasattr(pltpu, "CompilerParams"):   # very old jax: use defaults
        return None
    return pltpu.CompilerParams(
        dimension_semantics=("parallel",),
        vmem_limit_bytes=_vmem_limit_bytes(),
    )


def _semhash_tail_jax(x_tail, training, key):
    """Plain-JAX path for the tiny (< 8*lane elements) remainder."""
    if not training:
        return (x_tail > 0).astype(x_tail.dtype)
    k_n, k_u = jax.random.split(key)
    y = x_tail.astype(jnp.float32) + jax.random.normal(k_n, x_tail.shape, jnp.float32)
    v1 = _saturated_sigmoid(y)
    v2 = (y > 0.0).astype(jnp.float32)
    coin = jax.random.bernoulli(k_u, 0.5, x_tail.shape)
    return jnp.where(coin, v1, v2).astype(x_tail.dtype)


# ------------------------------- wrapper -------------------------------

def semantic_hashing_pallas(x, training: bool = True, seed: int = 0):
    """SemanticHashing.forward.  Purely elementwise, so the tensor is flattened into
    a lane-dense (rows, lane) slab with no padding; any remainder is plain JAX."""
    orig_shape = x.shape
    dtype = x.dtype
    total = x.size
    flat = x.reshape(-1)

    lane, rows, block_rows = _slab_geometry(total)
    main = rows * lane
    tail = total - main

    outs = []
    if main > 0:
        # slice only when a tail exists (slicing the full array would be a copy)
        x2 = (flat[:main] if tail else flat).reshape(rows, lane)
        grid = (pl.cdiv(rows, block_rows),)
        spec = pl.BlockSpec((block_rows, lane), lambda i, *_: (i, 0))
        out_shape = jax.ShapeDtypeStruct((rows, lane), dtype)
        cp = _compiler_params()

        def _train_inkernel_rng():
            seed_arr = jnp.asarray([seed], dtype=jnp.int32)
            return pl.pallas_call(
                _semhash_train_kernel,
                out_shape=out_shape,
                grid_spec=pltpu.PrefetchScalarGridSpec(
                    num_scalar_prefetch=1,
                    grid=grid,
                    in_specs=[spec],
                    out_specs=spec,
                ),
                compiler_params=cp,
            )(seed_arr, x2)

        def _train_extrng():
            # TODO(synk): fallback only; streams 2 extra f32 arrays from HBM.
            k_n, k_u = jax.random.split(jax.random.PRNGKey(seed))
            noise = jax.random.normal(k_n, (rows, lane), jnp.float32)
            u = jax.random.uniform(k_u, (rows, lane), jnp.float32)
            return pl.pallas_call(
                _semhash_train_kernel_extrng,
                out_shape=out_shape,
                grid=grid,
                in_specs=[spec, spec, spec],
                out_specs=spec,
                compiler_params=cp,
            )(x2, noise, u)

        if not training:
            out2 = pl.pallas_call(
                _semhash_eval_kernel,
                out_shape=out_shape,
                grid=grid,
                in_specs=[spec],
                out_specs=spec,
                compiler_params=cp,
            )(x2)
        elif _HAS_INKERNEL_RNG:
            try:
                out2 = _train_inkernel_rng()
            except Exception:
                out2 = _train_extrng()
        else:
            out2 = _train_extrng()
        outs.append(out2.reshape(-1))

    if tail > 0:
        x_tail = flat[main:]
        tail_key = jax.random.fold_in(jax.random.PRNGKey(seed), total)
        outs.append(_semhash_tail_jax(x_tail, training, tail_key))

    out = outs[0] if len(outs) == 1 else jnp.concatenate(outs)
    return out.reshape(orig_shape)


if __name__ == "__main__":
    key = jax.random.PRNGKey(0)
    x = jax.random.normal(key, (2, 4, 16, 16), dtype=jnp.float32)

    # eval mode is deterministic: output must equal (x > 0).float()
    out_eval = jax.block_until_ready(semantic_hashing_pallas(x, training=False))
    assert out_eval.shape == x.shape and out_eval.dtype == x.dtype
    assert jnp.array_equal(out_eval, (x > 0).astype(jnp.float32)), "eval-mode mismatch"

    # ragged size: exercises the kernel main slab + plain-JAX tail path
    x_odd = jax.random.normal(jax.random.PRNGKey(1), (3, 7, 65), dtype=jnp.float32)
    out_odd = jax.block_until_ready(semantic_hashing_pallas(x_odd, training=False))
    assert jnp.array_equal(out_odd, (x_odd > 0).astype(jnp.float32)), "tail-path mismatch"

    # training mode (nn.Module default self.training == True)
    out_train = jax.block_until_ready(semantic_hashing_pallas(x, training=True, seed=0))
    assert out_train.shape == x.shape and out_train.dtype == x.dtype
    assert bool(jnp.all((out_train >= 0.0) & (out_train <= 1.0)))
    mean_val = float(jnp.mean(out_train))
    assert 0.25 < mean_val < 0.75, f"unexpected training-mode mean {mean_val}"

    # same seed => same in-kernel PRNG stream => identical output
    out_train2 = jax.block_until_ready(semantic_hashing_pallas(x, training=True, seed=0))
    assert jnp.array_equal(out_train, out_train2), "training mode not deterministic per seed"

    print("KERNEL_OK")
</pallas_src>

<mosaic_0001>
module attributes {stable_mosaic.version = 11 : i64} {
  func.func @_semhash_eval_kernel(%arg0: i32, %arg1: memref<8x128xf32, #tpu.memory_space<vmem>>, %arg2: memref<8x128xf32, #tpu.memory_space<vmem>>) attributes {dimension_semantics = [#tpu.dimension_semantics<parallel>], iteration_bounds = array<i64: 2>, scalar_prefetch = 0 : i64, scratch_operands = 0 : i64, tpu.core_type = #tpu.core_type<tc>, window_params = [{transform_indices = @transform_0, window_bounds = array<i64: 8, 128>}, {transform_indices = @transform_1, window_bounds = array<i64: 8, 128>}]} {
    %c0 = arith.constant 0 : index
    %c0_0 = arith.constant 0 : index
    %0 = vector.load %arg1[%c0, %c0_0] : memref<8x128xf32, #tpu.memory_space<vmem>>, vector<8x128xf32>
    %cst = arith.constant 0.000000e+00 : f32
    %1 = vector.broadcast %cst : f32 to vector<8x128xf32>
    %2 = arith.cmpf ogt, %0, %1 : vector<8x128xf32>
    %3 = arith.extui %2 : vector<8x128xi1> to vector<8x128xi32>
    %4 = arith.sitofp %3 : vector<8x128xi32> to vector<8x128xf32>
    %c0_1 = arith.constant 0 : index
    %c0_2 = arith.constant 0 : index
    %5 = vector.load %arg2[%c0_1, %c0_2] : memref<8x128xf32, #tpu.memory_space<vmem>>, vector<8x128xf32>
    tpu.vector_store %arg2[%c0_1, %c0_2], %4 {strides = array<i32>} : memref<8x128xf32, #tpu.memory_space<vmem>>, vector<8x128xf32>,
    return
  }
  func.func @transform_0(%arg0: i32) -> (i32, i32) {
    %c0_i32 = arith.constant 0 : i32
    %c0_i32_0 = arith.constant 0 : i32
    return %arg0, %c0_i32 : i32, i32
  }
  func.func @transform_1(%arg0: i32) -> (i32, i32) {
    %c0_i32 = arith.constant 0 : i32
    %c0_i32_0 = arith.constant 0 : i32
    return %arg0, %c0_i32 : i32, i32
  }
}

</mosaic_0001>

<bundles_post_ra>
// kernel: tpu_custom_call.1
= control target key start
LH: loop header
LB: loop body
LE: loop exit
PB: predicated region body
PF: predicated region fallthrough
CT: control target
= control target key end

     0   :  { %6 = vsyncpa [#allocation3], 0  ;;  %s521_s0 = inlined_call_operand.hbm [shape: f32[16,128], index: 0, kind: input, shape index: {}]   ;;  %s522_s1 = inlined_call_operand.hbm [shape: f32[16,128], index: 1, kind: output, shape index: {}]  }
   0x1   :  { %8 = vsyncpa [#allocation3 + $0x1], 0 }
   0x2   :  { %9 = vsyncpa [#allocation4], 0 }
   0x3   :  { %11 = vsyncpa [#allocation4 + $0x1], 0  ;;  %s394_s6 = smov 0   ;;  %s396_s7 = smov 0  }
   0x4   :  { %s398_s8 = smov 0   ;;  %s400_s9 = smov 0  }
   0x5 LB: > { %s415_s10 = sadd.s32 4294967295, %s381_s9   ;;  %s225_s11 = sadd.s32 4294967294, %s381_s9   ;;  %s381_s9 = sphi %s400_s9, %s532_s9   ;;  %s377_s8 = sphi %s398_s8, %s531_s8   ;;  %s373_s7 = sphi %s396_s7, %s530_s7   ;;  %s369_s6 = sphi %s394_s6, %s529_s6  }
   0x6   : > { %s419_s12 = sadd.s32 1, %s381_s9   ;;  %s24_s13 = sadd.s32 1, %s377_s8 }
   0x7   : > { %s21_s14 = ssub.s32 %s381_s9, %s419_s12  ;;  %p31_p0 = scmp.ne.s32.totalorder %s377_s8, %s373_s7 }
   0x8   : > { %p22_p1 = scmp.eq.s32.totalorder %s21_s14, 0  ;;  %p32_p2 = scmp.eq.s32.totalorder %s381_s9, 0 }
   0x9   : > { %p37_p3 = scmp.ne.s32.totalorder %s373_s7, %s369_s6  ;;  %p38_p4 = scmp.eq.s32.totalorder %s415_s10, 0 }
   0xa   : > { %s431_s15 = scalar_select %p22_p1, %s377_s8, %s24_s13  }
   0xb   : > { %p433_p5 = por %p32_p2, %p31_p0  ;;  %p437_p6 = por %p38_p4, %p37_p3 }
   0xc   : > { %p61_p7 = scmp.eq.s32.totalorder %s415_s10, 1  ;;  %p67_p8 = scmp.eq.s32.totalorder %s225_s11, 1 }
   0xd   : > { %p250_p10 = scmp.lt.s32.totalorder %s381_s9, 2  ;;  %s87_s20 = sand.u32 1, %s377_s8  }
   0xe   : > { %p444_p11 = por %p61_p7, %p31_p0  ;;  %p448_p12 = por %p67_p8, %p37_p3 }
   0xf   : > { %s229_s21 = sshll.u32 %s381_s9, 3  ;;  %s228_s22 = sshll.u32 %s87_s20, 3 }
  0x10   : > { %s95_s25 = scalar_lea.hbm %s521_s0, %s229_s21  ;;  %s91_s27 = scalar_lea.vmem [#allocation2], %s228_s22 }
  0x11   : > { %s97_s26 = sshll.u32 %s95_s25, 4  ;;  %s99_s28 = sshll.u32 %s91_s27, 4  ;;  %s98_s26 = int_to_ptr.hbm [resolvable:$true] %s97_s26  ;;  %s100_s28 = int_to_ptr.vmem [resolvable:$true] %s99_s28 }
  0x12   : > { %p459_p13 = pnand %p250_p10, %p433_p5  ;;  %p230_p0 = scmp.ge.s32.totalorder %s381_s9, 1 }
  0x13   : > { %p104_p1 = scmp.lt.s32.totalorder %s381_s9, 3  ;;  %s88_s30 = scalar_lea.sflag [#allocation3], %s87_s20 }
  0x14   : > { %s285_s2 = sshra.s32 %s98_s26, 4  ;;  %p289_p3 = pneg %p459_p13  ;;  %s286_s2 = int_to_ptr.hbm [resolvable:$true] %s285_s2 }
  0x15   : > { %s287_s3 = scalar_lea.hbm %s286_s2, 8  ;;  %s292_s11 = scalar_lea.hbm %s521_s0, 16 }
  0x16   : > { %p288_p2 = scmp.ne.s32.totalorder %s286_s2, %s287_s3  ;;  %p293_p5 = scmp.lt.s32.totalorder %s286_s2, %s521_s0 }
  0x17   : > { %p294_p8 = scmp.lt.s32.totalorder %s292_s11, %s287_s3 }
  0x18   : > { %p290_p4 = pnand %p289_p3, %p288_p2 }
  0x19   : > { %p295_p10 = por %p294_p8, %p293_p5 }
  0x1a   : > { %p291_p7 = pneg %p290_p4 }
  0x1c   : > { %p296_p9 = pnand %p295_p10, %p291_p7 }
  0x1e   : > { %299 = shalt.err (!%p296_p9)
}
  0x1f   : > { %245 = dma.hbm_to_vmem [thread:$0]  (!%p459_p13), %s98_s26, 128, %s100_s28, %s88_s30  }
  0x20   : > { %p105_p2 = pnand %p230_p0, %p104_p1 }
  0x21   : > { %s480_s16 = sand.u32 (!%p105_p2), 1, %s373_s7  }
  0x22   : > { %108 = sbr.rel (%p105_p2) target bundleno = 55 (0x37), region = 24  ;;  %s231_s20 = sshll.u32 (!%p105_p2), %s480_s16, 3 }
  0x23   : > { %s111_s21 = scalar_lea.sflag (!%p105_p2), [#allocation3], %s480_s16  ;;  %s114_s22 = scalar_lea.vmem (!%p105_p2), [#allocation2], %s231_s20 }
  0x27   : > { %360 = dma.done.wait (%p437_p6), %s111_s21, 128  }
  0x28   : > { %362 = vsyncadd (%p437_p6), %s111_s21, 4294967168  ;;  %s235_s23 = sshll.u32 %s415_s10, 3  ;;  %s133_s27 = scalar_lea.vmem [#allocation5], %s231_s20  ;;  %v134_v0 = vld [vmem:[%s114_s22] sm:$0xff]  ;;  %v383_v1 = vmov 0.0  }
  0x29   : > { %s150_s26 = scalar_lea.hbm %s522_s1, %s235_s23  ;;  %s152_s28 = sshll.u32 %s133_s27, 4  ;;  %vm135_vm0 = vcmp.gt.f32.partialorder %v134_v0, 0.0  ;;  %s153_s28 = int_to_ptr.vmem [resolvable:$true] %s152_s28 }
  0x2a   : > { %s154_s29 = sshll.u32 %s150_s26, 4  ;;  %v233_v2 = vsel %vm135_vm0, 1.0, %v383_v1  ;;  %s140_s17 = scalar_lea.sflag [#allocation4], %s480_s16  ;;  %s155_s29 = int_to_ptr.hbm [resolvable:$true] %s154_s29 }
  0x2b   : > { %138 = vst [vmem:[%s133_s27] sm:$0xff] %v233_v2  ;;  %s329_s30 = sshra.s32 %s155_s29, 4  ;;  %s335_s4 = scalar_lea.hbm %s522_s1, 16  ;;  %s330_s30 = int_to_ptr.hbm [resolvable:$true] %s329_s30 }
  0x2c   : > { %s331_s2 = scalar_lea.hbm %s330_s30, 8  ;;  %p336_p0 = scmp.lt.s32.totalorder %s330_s30, %s522_s1 }
  0x2d   : > { %p332_p6 = scmp.ne.s32.totalorder %s330_s30, %s331_s2  ;;  %p337_p1 = scmp.lt.s32.totalorder %s335_s4, %s331_s2 }
  0x2f   : > { %p333_p9 = pnand %p332_p6, %p444_p11  ;;  %p338_p3 = por %p337_p1, %p336_p0 }
  0x31   : > { %p334_p13 = pneg %p333_p9 }
  0x33   : > { %p339_p4 = pnand %p338_p3, %p334_p13 }
  0x35   : > { %342 = shalt.err (!%p339_p4)
}
  0x36   : > { %240 = dma.vmem_to_hbm [thread:$0]  (%p444_p11), %s153_s28, 128, %s155_s29, %s140_s17  }
  0x37 PF: > { %s166_s13 = sand.u32 1, %s369_s6   ;;  %p528_p7 = scmp.ge.s32.totalorder %s381_s9, 2 }
  0x38   : > { %s167_s14 = scalar_lea.sflag [#allocation4], %s166_s13 }
  0x39   : > { %p247_p5 = pnand %p528_p7, %p448_p12 }
  0x3b   : > { %p248_p8 = pneg %p247_p5 }
  0x3d   : > { %364 = dma.done.wait (%p248_p8), %s167_s14, 128  }
  0x3e   : > { %366 = vsyncadd (%p248_p8), %s167_s14, 4294967168  ;;  %p14_p10 = scmp.ge.s32.totalorder %s419_s12, 4   ;;  %s529_s6 = smov %s373_s7 }
  0x3f   : > { %s530_s7 = smov %s377_s8  ;;  %s531_s8 = smov %s431_s15 }
  0x40   : > { %s532_s9 = smov %s419_s12  ;;  %16 = sbr.rel (!%p14_p10) target bundleno = 5 (0x5), region = 69 }
  0x45   :  { %173 = vsyncpa [#allocation3], 1 }
  0x46   :  { %175 = vsyncpa [#allocation3 + $0x1], 1 }
  0x47   :  { %176 = vsyncpa [#allocation4], 1 }
  0x48   :  { %178 = vsyncpa [#allocation4 + $0x1], 1 }

</bundles_post_ra>
